<compile_context>
chip_gen: v7x
topology: tpu7x:2x2x1
jax: 0.10.0
libtpu: 0.0.40
codegen_flags: <defaults>
</compile_context>

<pallas_src>
import jax
import jax.numpy as jnp
from jax import lax
from jax.experimental import pallas as pl
from jax.experimental.pallas import tpu as pltpu


def _round_up(x: int, m: int) -> int:
    return (x + m - 1) // m * m


def _lstm_chunk_kernel(xw_ref, wh_ref, h0_ref, c0_ref,
                       hseq_ref, cfin_ref, h_scr, c_scr):
    """One grid step == one TT-timestep chunk of the recurrence.

    xw_ref  : (TT, Bp, Cp) f32   precomputed x@Wx + b for this chunk (streamed)
    wh_ref  : (Cp, Cp)     bf16  hidden->gate weight, resident across the grid
    h0_ref  : (Bp, Cp)     f32   initial hidden (read only at chunk 0)
    c0_ref  : (Bp, Cp)     f32   initial cell   (read only at chunk 0)
    hseq_ref: (TT, Bp, Cp) bf16  per-step hidden output chunk (lane dense)
    cfin_ref: (Bp, Cp)     f32   final cell (written at last chunk)
    h_scr/c_scr: f32 VMEM scratch carrying the recurrent state across chunks.
    """
    chunk = pl.program_id(0)

    @pl.when(chunk == 0)
    def _init():
        h_scr[...] = h0_ref[...]
        c_scr[...] = c0_ref[...]

    wh = wh_ref[...]                 # loop-invariant: hoisted out of the time loop
    tt_steps = xw_ref.shape[0]       # static chunk length

    def step(tt, carry):
        # Shared pre-activation of all gates (f = i = o = sigmoid(g)).
        g = xw_ref[tt] + jnp.dot(h_scr[...].astype(jnp.bfloat16), wh,
                                 preferred_element_type=jnp.float32)
        sig = jax.nn.sigmoid(g)          # forget / input / output gate (shared)
        th = jnp.tanh(g)                 # cell helper
        c_new = sig * (c_scr[...] + th)  # == cell*sig + tanh(g)*sig, one fewer vmul
        h_new = jnp.tanh(c_new) * sig
        c_scr[...] = c_new
        h_scr[...] = h_new
        hseq_ref[tt] = h_new.astype(hseq_ref.dtype)
        return carry

    # Short fixed trip count -> fully unrolled for LLO scheduler visibility.
    lax.fori_loop(0, tt_steps, step, 0, unroll=True)

    @pl.when(chunk == pl.num_programs(0) - 1)
    def _finalize():
        cfin_ref[...] = c_scr[...]


def prepare_gate_params(w_gate, b_gate, input_size, hidden_size):
    """One-time parameter prep (outside the per-step call path).

    Splits the torch-layout (C, I+H) gate weight into the x part (kept
    UNPADDED, used by the hoisted XLA input projection) and the h part
    (transposed, zero-padded to lane-dense (Cp, Cp), cast to bf16 for the
    in-kernel MXU dot).  Padded rows/cols are zero, so the padded lanes of the
    recurrent state stay exactly zero through time."""
    cell_size = w_gate.shape[0]
    c_pad = _round_up(max(cell_size, 1), 128)
    wx_bf = w_gate[:, :input_size].T.astype(jnp.bfloat16)        # (I, C)
    wh = w_gate[:, input_size:].T                                # (H, C)
    wh_bf = (jnp.zeros((c_pad, c_pad), jnp.float32)
             .at[:hidden_size, :cell_size].set(wh)
             .astype(jnp.bfloat16))
    b = b_gate.astype(jnp.float32)                               # (C,)
    return wx_bf, wh_bf, b


def lstm_forward_seq(x_seq, h0, c0, wx_bf, wh_bf, b, *, max_time_chunk=32):
    """Run T steps of the module's forward() inside a single pallas_call.

    x_seq: (T, B, I), h0: (B, H), c0: (B, C) with H == C (recurrence needs it).
    Returns (h_seq: (T, B, C), h_final: (B, C), c_final: (B, C)) in f32.
    """
    T, B, I = x_seq.shape
    H = h0.shape[1]
    C = c0.shape[1]
    assert H == C, "recurrence requires hidden_size == cell_size"
    c_pad = wh_bf.shape[0]
    b_pad = _round_up(B, 8)

    # Time chunk size: largest divisor of T not exceeding max_time_chunk
    # (for small T this is T itself -> the whole sequence in one grid step).
    TT = min(T, max_time_chunk)
    while T % TT != 0:
        TT -= 1
    num_chunks = T // TT

    # Hoisted input projection: one big bf16 MXU matmul over all timesteps,
    # bias folded in here so nothing is broadcast inside the recurrent loop.
    xw = jnp.einsum("tbi,ic->tbc", x_seq.astype(jnp.bfloat16), wx_bf,
                    preferred_element_type=jnp.float32) + b        # (T, B, C) f32

    # Zero-pad activations to (8, 128)-aligned, lane-dense tiles.
    xw_p = jnp.zeros((T, b_pad, c_pad), jnp.float32).at[:, :B, :C].set(xw)
    h0_p = jnp.zeros((b_pad, c_pad), jnp.float32).at[:B, :H].set(h0)
    c0_p = jnp.zeros((b_pad, c_pad), jnp.float32).at[:B, :C].set(c0)

    grid_spec = pltpu.PrefetchScalarGridSpec(
        num_scalar_prefetch=0,
        grid=(num_chunks,),
        in_specs=[
            pl.BlockSpec((TT, b_pad, c_pad), lambda c: (c, 0, 0)),  # xw chunk (streamed)
            pl.BlockSpec((c_pad, c_pad), lambda c: (0, 0)),         # Wh (resident, bf16)
            pl.BlockSpec((b_pad, c_pad), lambda c: (0, 0)),         # h0
            pl.BlockSpec((b_pad, c_pad), lambda c: (0, 0)),         # c0
        ],
        out_specs=[
            pl.BlockSpec((TT, b_pad, c_pad), lambda c: (c, 0, 0)),  # hidden per chunk
            pl.BlockSpec((b_pad, c_pad), lambda c: (0, 0)),         # final cell
        ],
        scratch_shapes=[
            pltpu.VMEM((b_pad, c_pad), jnp.float32),   # hidden carry (f32)
            pltpu.VMEM((b_pad, c_pad), jnp.float32),   # cell carry  (f32)
        ],
    )

    h_seq_p, c_fin_p = pl.pallas_call(
        _lstm_chunk_kernel,
        out_shape=(jax.ShapeDtypeStruct((T, b_pad, c_pad), jnp.bfloat16),
                   jax.ShapeDtypeStruct((b_pad, c_pad), jnp.float32)),
        grid_spec=grid_spec,
        compiler_params=pltpu.CompilerParams(
            dimension_semantics=("arbitrary",)),   # time carries state -> sequential
    )(xw_p, wh_bf, h0_p, c0_p)

    h_seq = h_seq_p[:, :B, :C].astype(jnp.float32)
    return h_seq, h_seq[-1], c_fin_p[:B, :C]


def lstm_forward(x, h, c, wx_bf, wh_bf, b):
    """Single-step forward() matching the PyTorch module exactly (T == 1)."""
    _, h_new, c_new = lstm_forward_seq(x[None], h, c, wx_bf, wh_bf, b)
    return h_new, c_new


def _reference_step(x, h, c, w_gate, b_gate):
    comb = jnp.concatenate([x, h], axis=1)
    g = comb @ w_gate.T + b_gate
    sig = jax.nn.sigmoid(g)
    th = jnp.tanh(g)
    c_new = c * sig + th * sig
    h_new = jnp.tanh(c_new) * sig
    return h_new, c_new


if __name__ == "__main__":
    # module config (small, shapes implied by forward):
    input_size, hidden_size, cell_size, output_size = 16, 32, 32, 8
    batch, seq_len = 8, 8

    key = jax.random.PRNGKey(0)
    k_x, k_h, k_c, k_w, k_b, k_wo, k_bo = jax.random.split(key, 7)

    # deterministic parameter init (PyTorch nn.Linear style uniform bound)
    bound_gate = 1.0 / jnp.sqrt(float(input_size + hidden_size))
    w_gate = jax.random.uniform(k_w, (cell_size, input_size + hidden_size),
                                jnp.float32, -bound_gate, bound_gate)
    b_gate = jax.random.uniform(k_b, (cell_size,), jnp.float32,
                                -bound_gate, bound_gate)
    # self.output / LogSoftmax are unused in forward(); init for fidelity only.
    bound_out = 1.0 / jnp.sqrt(float(hidden_size))
    w_out = jax.random.uniform(k_wo, (output_size, hidden_size),
                               jnp.float32, -bound_out, bound_out)
    b_out = jax.random.uniform(k_bo, (output_size,), jnp.float32,
                               -bound_out, bound_out)

    x_seq = jax.random.normal(k_x, (seq_len, batch, input_size), jnp.float32)
    h0 = jax.random.normal(k_h, (batch, hidden_size), jnp.float32)
    c0 = jax.random.normal(k_c, (batch, cell_size), jnp.float32)

    # One-time weight prep (split / transpose / pad / bf16), outside the call path.
    wx_bf, wh_bf, b_p = prepare_gate_params(w_gate, b_gate, input_size, hidden_size)

    h_seq, h_fin, c_fin = lstm_forward_seq(x_seq, h0, c0, wx_bf, wh_bf, b_p)
    jax.block_until_ready((h_seq, h_fin, c_fin))

    # Reference: Python loop over the module's single-step forward() in f32.
    h_ref, c_ref = h0, c0
    h_refs = []
    for t in range(seq_len):
        h_ref, c_ref = _reference_step(x_seq[t], h_ref, c_ref, w_gate, b_gate)
        h_refs.append(h_ref)
    h_seq_ref = jnp.stack(h_refs, axis=0)

    # Tolerance loosened for bf16 MXU operands / bf16 hseq writeback.
    atol = rtol = 2.5e-2
    assert jnp.allclose(h_seq, h_seq_ref, atol=atol, rtol=rtol), "hidden seq mismatch"
    assert jnp.allclose(h_fin, h_ref, atol=atol, rtol=rtol), "final hidden mismatch"
    assert jnp.allclose(c_fin, c_ref, atol=atol, rtol=rtol), "final cell mismatch"
    print("KERNEL_OK")
</pallas_src>

<mosaic_0001>
module attributes {stable_mosaic.version = 11 : i64} {
  func.func @_lstm_chunk_kernel(%arg0: i32, %arg1: memref<8x8x128xf32, #tpu.memory_space<vmem>>, %arg2: memref<128x128xbf16, #tpu.memory_space<vmem>>, %arg3: memref<8x128xf32, #tpu.memory_space<vmem>>, %arg4: memref<8x128xf32, #tpu.memory_space<vmem>>, %arg5: memref<8x8x128xbf16, #tpu.memory_space<vmem>>, %arg6: memref<8x128xf32, #tpu.memory_space<vmem>>, %arg7: memref<8x128xf32, #tpu.memory_space<vmem>>, %arg8: memref<8x128xf32, #tpu.memory_space<vmem>>) attributes {dimension_semantics = [#tpu.dimension_semantics<arbitrary>], iteration_bounds = array<i64: 1>, scalar_prefetch = 0 : i64, scratch_operands = 2 : i64, tpu.core_type = #tpu.core_type<tc>, window_params = [{transform_indices = @transform_0, window_bounds = array<i64: 8, 8, 128>}, {pipeline_mode = #tpu.pipeline_mode<synchronous>, transform_indices = @transform_1, window_bounds = array<i64: 128, 128>}, {pipeline_mode = #tpu.pipeline_mode<synchronous>, transform_indices = @transform_2, window_bounds = array<i64: 8, 128>}, {pipeline_mode = #tpu.pipeline_mode<synchronous>, transform_indices = @transform_3, window_bounds = array<i64: 8, 128>}, {transform_indices = @transform_4, window_bounds = array<i64: 8, 8, 128>}, {pipeline_mode = #tpu.pipeline_mode<synchronous>, transform_indices = @transform_5, window_bounds = array<i64: 8, 128>}]} {
    %c0_i32 = arith.constant 0 : i32
    %0 = arith.cmpi eq, %arg0, %c0_i32 : i32
    %1 = arith.extui %0 : i1 to i32
    %c0_i32_0 = arith.constant 0 : i32
    %2 = arith.cmpi ne, %1, %c0_i32_0 : i32
    scf.if %2 {
      %c0_116 = arith.constant 0 : index
      %c0_117 = arith.constant 0 : index
      %207 = vector.load %arg3[%c0_116, %c0_117] : memref<8x128xf32, #tpu.memory_space<vmem>>, vector<8x128xf32>
      %c0_118 = arith.constant 0 : index
      %c0_119 = arith.constant 0 : index
      %208 = vector.load %arg7[%c0_118, %c0_119] : memref<8x128xf32, #tpu.memory_space<vmem>>, vector<8x128xf32>
      tpu.vector_store %arg7[%c0_118, %c0_119], %207 {strides = array<i32>} : memref<8x128xf32, #tpu.memory_space<vmem>>, vector<8x128xf32>,
      %c0_120 = arith.constant 0 : index
      %c0_121 = arith.constant 0 : index
      %209 = vector.load %arg4[%c0_120, %c0_121] : memref<8x128xf32, #tpu.memory_space<vmem>>, vector<8x128xf32>
      %c0_122 = arith.constant 0 : index
      %c0_123 = arith.constant 0 : index
      %210 = vector.load %arg8[%c0_122, %c0_123] : memref<8x128xf32, #tpu.memory_space<vmem>>, vector<8x128xf32>
      tpu.vector_store %arg8[%c0_122, %c0_123], %209 {strides = array<i32>} : memref<8x128xf32, #tpu.memory_space<vmem>>, vector<8x128xf32>,
    } else {
    }
    %c0 = arith.constant 0 : index
    %c0_1 = arith.constant 0 : index
    %3 = vector.load %arg2[%c0, %c0_1] : memref<128x128xbf16, #tpu.memory_space<vmem>>, vector<128x128xbf16>
    %c0_i32_2 = arith.constant 0 : i32
    %4 = arith.index_cast %c0_i32_2 : i32 to index
    %c0_3 = arith.constant 0 : index
    %c0_4 = arith.constant 0 : index
    %5 = vector.load %arg1[%4, %c0_3, %c0_4] : memref<8x8x128xf32, #tpu.memory_space<vmem>>, vector<1x8x128xf32>
    %6 = vector.shape_cast %5 : vector<1x8x128xf32> to vector<8x128xf32>
    %c0_5 = arith.constant 0 : index
    %c0_6 = arith.constant 0 : index
    %7 = vector.load %arg7[%c0_5, %c0_6] : memref<8x128xf32, #tpu.memory_space<vmem>>, vector<8x128xf32>
    %8 = arith.truncf %7 : vector<8x128xf32> to vector<8x128xbf16>
    %cst = arith.constant dense<0.000000e+00> : vector<8x128xf32>
    %9 = tpu.matmul %8, %3, %cst {dimension_numbers = #tpu.dot_dimension_numbers<[1], [0], [0], [1], [0, 0, 1, 1], [], []>} : vector<8x128xbf16>, vector<128x128xbf16>, vector<8x128xf32> -> vector<8x128xf32>
    %10 = arith.addf %6, %9 : vector<8x128xf32>
    %11 = arith.negf %10 : vector<8x128xf32>
    %12 = math.exp %11 : vector<8x128xf32>
    %cst_7 = arith.constant 1.000000e+00 : f32
    %13 = vector.broadcast %cst_7 : f32 to vector<8x128xf32>
    %14 = arith.addf %13, %12 : vector<8x128xf32>
    %15 = arith.divf %13, %14 : vector<8x128xf32>
    %16 = math.tanh %10 : vector<8x128xf32>
    %c0_8 = arith.constant 0 : index
    %c0_9 = arith.constant 0 : index
    %17 = vector.load %arg8[%c0_8, %c0_9] : memref<8x128xf32, #tpu.memory_space<vmem>>, vector<8x128xf32>
    %18 = arith.addf %17, %16 : vector<8x128xf32>
    %19 = arith.mulf %15, %18 : vector<8x128xf32>
    %20 = math.tanh %19 : vector<8x128xf32>
    %21 = arith.mulf %20, %15 : vector<8x128xf32>
    %c0_10 = arith.constant 0 : index
    %c0_11 = arith.constant 0 : index
    %22 = vector.load %arg8[%c0_10, %c0_11] : memref<8x128xf32, #tpu.memory_space<vmem>>, vector<8x128xf32>
    tpu.vector_store %arg8[%c0_10, %c0_11], %19 {strides = array<i32>} : memref<8x128xf32, #tpu.memory_space<vmem>>, vector<8x128xf32>,
    %c0_12 = arith.constant 0 : index
    %c0_13 = arith.constant 0 : index
    %23 = vector.load %arg7[%c0_12, %c0_13] : memref<8x128xf32, #tpu.memory_space<vmem>>, vector<8x128xf32>
    tpu.vector_store %arg7[%c0_12, %c0_13], %21 {strides = array<i32>} : memref<8x128xf32, #tpu.memory_space<vmem>>, vector<8x128xf32>,
    %24 = arith.truncf %21 : vector<8x128xf32> to vector<8x128xbf16>
    %25 = arith.index_cast %c0_i32_2 : i32 to index
    %c0_14 = arith.constant 0 : index
    %c0_15 = arith.constant 0 : index
    %26 = vector.load %arg5[%25, %c0_14, %c0_15] : memref<8x8x128xbf16, #tpu.memory_space<vmem>>, vector<1x8x128xbf16>
    %27 = vector.shape_cast %26 : vector<1x8x128xbf16> to vector<8x128xbf16>
    %28 = vector.shape_cast %24 : vector<8x128xbf16> to vector<1x8x128xbf16>
    tpu.vector_store %arg5[%25, %c0_14, %c0_15], %28 {strides = array<i32>} : memref<8x8x128xbf16, #tpu.memory_space<vmem>>, vector<1x8x128xbf16>,
    %c1_i32 = arith.constant 1 : i32
    %29 = arith.index_cast %c1_i32 : i32 to index
    %c0_16 = arith.constant 0 : index
    %c0_17 = arith.constant 0 : index
    %30 = vector.load %arg1[%29, %c0_16, %c0_17] : memref<8x8x128xf32, #tpu.memory_space<vmem>>, vector<1x8x128xf32>
    %31 = vector.shape_cast %30 : vector<1x8x128xf32> to vector<8x128xf32>
    %c0_18 = arith.constant 0 : index
    %c0_19 = arith.constant 0 : index
    %32 = vector.load %arg7[%c0_18, %c0_19] : memref<8x128xf32, #tpu.memory_space<vmem>>, vector<8x128xf32>
    %33 = arith.truncf %32 : vector<8x128xf32> to vector<8x128xbf16>
    %cst_20 = arith.constant dense<0.000000e+00> : vector<8x128xf32>
    %34 = tpu.matmul %33, %3, %cst_20 {dimension_numbers = #tpu.dot_dimension_numbers<[1], [0], [0], [1], [0, 0, 1, 1], [], []>} : vector<8x128xbf16>, vector<128x128xbf16>, vector<8x128xf32> -> vector<8x128xf32>
    %35 = arith.addf %31, %34 : vector<8x128xf32>
    %36 = arith.negf %35 : vector<8x128xf32>
    %37 = math.exp %36 : vector<8x128xf32>
    %cst_21 = arith.constant 1.000000e+00 : f32
    %38 = vector.broadcast %cst_21 : f32 to vector<8x128xf32>
    %39 = arith.addf %38, %37 : vector<8x128xf32>
    %40 = arith.divf %38, %39 : vector<8x128xf32>
    %41 = math.tanh %35 : vector<8x128xf32>
    %c0_22 = arith.constant 0 : index
    %c0_23 = arith.constant 0 : index
    %42 = vector.load %arg8[%c0_22, %c0_23] : memref<8x128xf32, #tpu.memory_space<vmem>>, vector<8x128xf32>
    %43 = arith.addf %42, %41 : vector<8x128xf32>
    %44 = arith.mulf %40, %43 : vector<8x128xf32>
    %45 = math.tanh %44 : vector<8x128xf32>
    %46 = arith.mulf %45, %40 : vector<8x128xf32>
    %c0_24 = arith.constant 0 : index
    %c0_25 = arith.constant 0 : index
    %47 = vector.load %arg8[%c0_24, %c0_25] : memref<8x128xf32, #tpu.memory_space<vmem>>, vector<8x128xf32>
    tpu.vector_store %arg8[%c0_24, %c0_25], %44 {strides = array<i32>} : memref<8x128xf32, #tpu.memory_space<vmem>>, vector<8x128xf32>,
    %c0_26 = arith.constant 0 : index
    %c0_27 = arith.constant 0 : index
    %48 = vector.load %arg7[%c0_26, %c0_27] : memref<8x128xf32, #tpu.memory_space<vmem>>, vector<8x128xf32>
    tpu.vector_store %arg7[%c0_26, %c0_27], %46 {strides = array<i32>} : memref<8x128xf32, #tpu.memory_space<vmem>>, vector<8x128xf32>,
    %49 = arith.truncf %46 : vector<8x128xf32> to vector<8x128xbf16>
    %50 = arith.index_cast %c1_i32 : i32 to index
    %c0_28 = arith.constant 0 : index
    %c0_29 = arith.constant 0 : index
    %51 = vector.load %arg5[%50, %c0_28, %c0_29] : memref<8x8x128xbf16, #tpu.memory_space<vmem>>, vector<1x8x128xbf16>
    %52 = vector.shape_cast %51 : vector<1x8x128xbf16> to vector<8x128xbf16>
    %53 = vector.shape_cast %49 : vector<8x128xbf16> to vector<1x8x128xbf16>
    tpu.vector_store %arg5[%50, %c0_28, %c0_29], %53 {strides = array<i32>} : memref<8x8x128xbf16, #tpu.memory_space<vmem>>, vector<1x8x128xbf16>,
    %c2_i32 = arith.constant 2 : i32
    %54 = arith.index_cast %c2_i32 : i32 to index
    %c0_30 = arith.constant 0 : index
    %c0_31 = arith.constant 0 : index
    %55 = vector.load %arg1[%54, %c0_30, %c0_31] : memref<8x8x128xf32, #tpu.memory_space<vmem>>, vector<1x8x128xf32>
    %56 = vector.shape_cast %55 : vector<1x8x128xf32> to vector<8x128xf32>
    %c0_32 = arith.constant 0 : index
    %c0_33 = arith.constant 0 : index
    %57 = vector.load %arg7[%c0_32, %c0_33] : memref<8x128xf32, #tpu.memory_space<vmem>>, vector<8x128xf32>
    %58 = arith.truncf %57 : vector<8x128xf32> to vector<8x128xbf16>
    %cst_34 = arith.constant dense<0.000000e+00> : vector<8x128xf32>
    %59 = tpu.matmul %58, %3, %cst_34 {dimension_numbers = #tpu.dot_dimension_numbers<[1], [0], [0], [1], [0, 0, 1, 1], [], []>} : vector<8x128xbf16>, vector<128x128xbf16>, vector<8x128xf32> -> vector<8x128xf32>
    %60 = arith.addf %56, %59 : vector<8x128xf32>
    %61 = arith.negf %60 : vector<8x128xf32>
    %62 = math.exp %61 : vector<8x128xf32>
    %cst_35 = arith.constant 1.000000e+00 : f32
    %63 = vector.broadcast %cst_35 : f32 to vector<8x128xf32>
    %64 = arith.addf %63, %62 : vector<8x128xf32>
    %65 = arith.divf %63, %64 : vector<8x128xf32>
    %66 = math.tanh %60 : vector<8x128xf32>
    %c0_36 = arith.constant 0 : index
    %c0_37 = arith.constant 0 : index
    %67 = vector.load %arg8[%c0_36, %c0_37] : memref<8x128xf32, #tpu.memory_space<vmem>>, vector<8x128xf32>
    %68 = arith.addf %67, %66 : vector<8x128xf32>
    %69 = arith.mulf %65, %68 : vector<8x128xf32>
    %70 = math.tanh %69 : vector<8x128xf32>
    %71 = arith.mulf %70, %65 : vector<8x128xf32>
    %c0_38 = arith.constant 0 : index
    %c0_39 = arith.constant 0 : index
    %72 = vector.load %arg8[%c0_38, %c0_39] : memref<8x128xf32, #tpu.memory_space<vmem>>, vector<8x128xf32>
    tpu.vector_store %arg8[%c0_38, %c0_39], %69 {strides = array<i32>} : memref<8x128xf32, #tpu.memory_space<vmem>>, vector<8x128xf32>,
    %c0_40 = arith.constant 0 : index
    %c0_41 = arith.constant 0 : index
    %73 = vector.load %arg7[%c0_40, %c0_41] : memref<8x128xf32, #tpu.memory_space<vmem>>, vector<8x128xf32>
    tpu.vector_store %arg7[%c0_40, %c0_41], %71 {strides = array<i32>} : memref<8x128xf32, #tpu.memory_space<vmem>>, vector<8x128xf32>,
    %74 = arith.truncf %71 : vector<8x128xf32> to vector<8x128xbf16>
    %75 = arith.index_cast %c2_i32 : i32 to index
    %c0_42 = arith.constant 0 : index
    %c0_43 = arith.constant 0 : index
    %76 = vector.load %arg5[%75, %c0_42, %c0_43] : memref<8x8x128xbf16, #tpu.memory_space<vmem>>, vector<1x8x128xbf16>
    %77 = vector.shape_cast %76 : vector<1x8x128xbf16> to vector<8x128xbf16>
    %78 = vector.shape_cast %74 : vector<8x128xbf16> to vector<1x8x128xbf16>
    tpu.vector_store %arg5[%75, %c0_42, %c0_43], %78 {strides = array<i32>} : memref<8x8x128xbf16, #tpu.memory_space<vmem>>, vector<1x8x128xbf16>,
    %c3_i32 = arith.constant 3 : i32
    %79 = arith.index_cast %c3_i32 : i32 to index
    %c0_44 = arith.constant 0 : index
    %c0_45 = arith.constant 0 : index
    %80 = vector.load %arg1[%79, %c0_44, %c0_45] : memref<8x8x128xf32, #tpu.memory_space<vmem>>, vector<1x8x128xf32>
    %81 = vector.shape_cast %80 : vector<1x8x128xf32> to vector<8x128xf32>
    %c0_46 = arith.constant 0 : index
    %c0_47 = arith.constant 0 : index
    %82 = vector.load %arg7[%c0_46, %c0_47] : memref<8x128xf32, #tpu.memory_space<vmem>>, vector<8x128xf32>
    %83 = arith.truncf %82 : vector<8x128xf32> to vector<8x128xbf16>
    %cst_48 = arith.constant dense<0.000000e+00> : vector<8x128xf32>
    %84 = tpu.matmul %83, %3, %cst_48 {dimension_numbers = #tpu.dot_dimension_numbers<[1], [0], [0], [1], [0, 0, 1, 1], [], []>} : vector<8x128xbf16>, vector<128x128xbf16>, vector<8x128xf32> -> vector<8x128xf32>
    %85 = arith.addf %81, %84 : vector<8x128xf32>
    %86 = arith.negf %85 : vector<8x128xf32>
    %87 = math.exp %86 : vector<8x128xf32>
    %cst_49 = arith.constant 1.000000e+00 : f32
    %88 = vector.broadcast %cst_49 : f32 to vector<8x128xf32>
    %89 = arith.addf %88, %87 : vector<8x128xf32>
    %90 = arith.divf %88, %89 : vector<8x128xf32>
    %91 = math.tanh %85 : vector<8x128xf32>
    %c0_50 = arith.constant 0 : index
    %c0_51 = arith.constant 0 : index
    %92 = vector.load %arg8[%c0_50, %c0_51] : memref<8x128xf32, #tpu.memory_space<vmem>>, vector<8x128xf32>
    %93 = arith.addf %92, %91 : vector<8x128xf32>
    %94 = arith.mulf %90, %93 : vector<8x128xf32>
    %95 = math.tanh %94 : vector<8x128xf32>
    %96 = arith.mulf %95, %90 : vector<8x128xf32>
    %c0_52 = arith.constant 0 : index
    %c0_53 = arith.constant 0 : index
    %97 = vector.load %arg8[%c0_52, %c0_53] : memref<8x128xf32, #tpu.memory_space<vmem>>, vector<8x128xf32>
    tpu.vector_store %arg8[%c0_52, %c0_53], %94 {strides = array<i32>} : memref<8x128xf32, #tpu.memory_space<vmem>>, vector<8x128xf32>,
    %c0_54 = arith.constant 0 : index
    %c0_55 = arith.constant 0 : index
    %98 = vector.load %arg7[%c0_54, %c0_55] : memref<8x128xf32, #tpu.memory_space<vmem>>, vector<8x128xf32>
    tpu.vector_store %arg7[%c0_54, %c0_55], %96 {strides = array<i32>} : memref<8x128xf32, #tpu.memory_space<vmem>>, vector<8x128xf32>,
    %99 = arith.truncf %96 : vector<8x128xf32> to vector<8x128xbf16>
    %100 = arith.index_cast %c3_i32 : i32 to index
    %c0_56 = arith.constant 0 : index
    %c0_57 = arith.constant 0 : index
    %101 = vector.load %arg5[%100, %c0_56, %c0_57] : memref<8x8x128xbf16, #tpu.memory_space<vmem>>, vector<1x8x128xbf16>
    %102 = vector.shape_cast %101 : vector<1x8x128xbf16> to vector<8x128xbf16>
    %103 = vector.shape_cast %99 : vector<8x128xbf16> to vector<1x8x128xbf16>
    tpu.vector_store %arg5[%100, %c0_56, %c0_57], %103 {strides = array<i32>} : memref<8x8x128xbf16, #tpu.memory_space<vmem>>, vector<1x8x128xbf16>,
    %c4_i32 = arith.constant 4 : i32
    %104 = arith.index_cast %c4_i32 : i32 to index
    %c0_58 = arith.constant 0 : index
    %c0_59 = arith.constant 0 : index
    %105 = vector.load %arg1[%104, %c0_58, %c0_59] : memref<8x8x128xf32, #tpu.memory_space<vmem>>, vector<1x8x128xf32>
    %106 = vector.shape_cast %105 : vector<1x8x128xf32> to vector<8x128xf32>
    %c0_60 = arith.constant 0 : index
    %c0_61 = arith.constant 0 : index
    %107 = vector.load %arg7[%c0_60, %c0_61] : memref<8x128xf32, #tpu.memory_space<vmem>>, vector<8x128xf32>
    %108 = arith.truncf %107 : vector<8x128xf32> to vector<8x128xbf16>
    %cst_62 = arith.constant dense<0.000000e+00> : vector<8x128xf32>
    %109 = tpu.matmul %108, %3, %cst_62 {dimension_numbers = #tpu.dot_dimension_numbers<[1], [0], [0], [1], [0, 0, 1, 1], [], []>} : vector<8x128xbf16>, vector<128x128xbf16>, vector<8x128xf32> -> vector<8x128xf32>
    %110 = arith.addf %106, %109 : vector<8x128xf32>
    %111 = arith.negf %110 : vector<8x128xf32>
    %112 = math.exp %111 : vector<8x128xf32>
    %cst_63 = arith.constant 1.000000e+00 : f32
    %113 = vector.broadcast %cst_63 : f32 to vector<8x128xf32>
    %114 = arith.addf %113, %112 : vector<8x128xf32>
    %115 = arith.divf %113, %114 : vector<8x128xf32>
    %116 = math.tanh %110 : vector<8x128xf32>
    %c0_64 = arith.constant 0 : index
    %c0_65 = arith.constant 0 : index
    %117 = vector.load %arg8[%c0_64, %c0_65] : memref<8x128xf32, #tpu.memory_space<vmem>>, vector<8x128xf32>
    %118 = arith.addf %117, %116 : vector<8x128xf32>
    %119 = arith.mulf %115, %118 : vector<8x128xf32>
    %120 = math.tanh %119 : vector<8x128xf32>
    %121 = arith.mulf %120, %115 : vector<8x128xf32>
    %c0_66 = arith.constant 0 : index
    %c0_67 = arith.constant 0 : index
    %122 = vector.load %arg8[%c0_66, %c0_67] : memref<8x128xf32, #tpu.memory_space<vmem>>, vector<8x128xf32>
    tpu.vector_store %arg8[%c0_66, %c0_67], %119 {strides = array<i32>} : memref<8x128xf32, #tpu.memory_space<vmem>>, vector<8x128xf32>,
    %c0_68 = arith.constant 0 : index
    %c0_69 = arith.constant 0 : index
    %123 = vector.load %arg7[%c0_68, %c0_69] : memref<8x128xf32, #tpu.memory_space<vmem>>, vector<8x128xf32>
    tpu.vector_store %arg7[%c0_68, %c0_69], %121 {strides = array<i32>} : memref<8x128xf32, #tpu.memory_space<vmem>>, vector<8x128xf32>,
    %124 = arith.truncf %121 : vector<8x128xf32> to vector<8x128xbf16>
    %125 = arith.index_cast %c4_i32 : i32 to index
    %c0_70 = arith.constant 0 : index
    %c0_71 = arith.constant 0 : index
    %126 = vector.load %arg5[%125, %c0_70, %c0_71] : memref<8x8x128xbf16, #tpu.memory_space<vmem>>, vector<1x8x128xbf16>
    %127 = vector.shape_cast %126 : vector<1x8x128xbf16> to vector<8x128xbf16>
    %128 = vector.shape_cast %124 : vector<8x128xbf16> to vector<1x8x128xbf16>
    tpu.vector_store %arg5[%125, %c0_70, %c0_71], %128 {strides = array<i32>} : memref<8x8x128xbf16, #tpu.memory_space<vmem>>, vector<1x8x128xbf16>,
    %c5_i32 = arith.constant 5 : i32
    %129 = arith.index_cast %c5_i32 : i32 to index
    %c0_72 = arith.constant 0 : index
    %c0_73 = arith.constant 0 : index
    %130 = vector.load %arg1[%129, %c0_72, %c0_73] : memref<8x8x128xf32, #tpu.memory_space<vmem>>, vector<1x8x128xf32>
    %131 = vector.shape_cast %130 : vector<1x8x128xf32> to vector<8x128xf32>
    %c0_74 = arith.constant 0 : index
    %c0_75 = arith.constant 0 : index
    %132 = vector.load %arg7[%c0_74, %c0_75] : memref<8x128xf32, #tpu.memory_space<vmem>>, vector<8x128xf32>
    %133 = arith.truncf %132 : vector<8x128xf32> to vector<8x128xbf16>
    %cst_76 = arith.constant dense<0.000000e+00> : vector<8x128xf32>
    %134 = tpu.matmul %133, %3, %cst_76 {dimension_numbers = #tpu.dot_dimension_numbers<[1], [0], [0], [1], [0, 0, 1, 1], [], []>} : vector<8x128xbf16>, vector<128x128xbf16>, vector<8x128xf32> -> vector<8x128xf32>
    %135 = arith.addf %131, %134 : vector<8x128xf32>
    %136 = arith.negf %135 : vector<8x128xf32>
    %137 = math.exp %136 : vector<8x128xf32>
    %cst_77 = arith.constant 1.000000e+00 : f32
    %138 = vector.broadcast %cst_77 : f32 to vector<8x128xf32>
    %139 = arith.addf %138, %137 : vector<8x128xf32>
    %140 = arith.divf %138, %139 : vector<8x128xf32>
    %141 = math.tanh %135 : vector<8x128xf32>
    %c0_78 = arith.constant 0 : index
    %c0_79 = arith.constant 0 : index
    %142 = vector.load %arg8[%c0_78, %c0_79] : memref<8x128xf32, #tpu.memory_space<vmem>>, vector<8x128xf32>
    %143 = arith.addf %142, %141 : vector<8x128xf32>
    %144 = arith.mulf %140, %143 : vector<8x128xf32>
    %145 = math.tanh %144 : vector<8x128xf32>
    %146 = arith.mulf %145, %140 : vector<8x128xf32>
    %c0_80 = arith.constant 0 : index
    %c0_81 = arith.constant 0 : index
    %147 = vector.load %arg8[%c0_80, %c0_81] : memref<8x128xf32, #tpu.memory_space<vmem>>, vector<8x128xf32>
    tpu.vector_store %arg8[%c0_80, %c0_81], %144 {strides = array<i32>} : memref<8x128xf32, #tpu.memory_space<vmem>>, vector<8x128xf32>,
    %c0_82 = arith.constant 0 : index
    %c0_83 = arith.constant 0 : index
    %148 = vector.load %arg7[%c0_82, %c0_83] : memref<8x128xf32, #tpu.memory_space<vmem>>, vector<8x128xf32>
    tpu.vector_store %arg7[%c0_82, %c0_83], %146 {strides = array<i32>} : memref<8x128xf32, #tpu.memory_space<vmem>>, vector<8x128xf32>,
    %149 = arith.truncf %146 : vector<8x128xf32> to vector<8x128xbf16>
    %150 = arith.index_cast %c5_i32 : i32 to index
    %c0_84 = arith.constant 0 : index
    %c0_85 = arith.constant 0 : index
    %151 = vector.load %arg5[%150, %c0_84, %c0_85] : memref<8x8x128xbf16, #tpu.memory_space<vmem>>, vector<1x8x128xbf16>
    %152 = vector.shape_cast %151 : vector<1x8x128xbf16> to vector<8x128xbf16>
    %153 = vector.shape_cast %149 : vector<8x128xbf16> to vector<1x8x128xbf16>
    tpu.vector_store %arg5[%150, %c0_84, %c0_85], %153 {strides = array<i32>} : memref<8x8x128xbf16, #tpu.memory_space<vmem>>, vector<1x8x128xbf16>,
    %c6_i32 = arith.constant 6 : i32
    %154 = arith.index_cast %c6_i32 : i32 to index
    %c0_86 = arith.constant 0 : index
    %c0_87 = arith.constant 0 : index
    %155 = vector.load %arg1[%154, %c0_86, %c0_87] : memref<8x8x128xf32, #tpu.memory_space<vmem>>, vector<1x8x128xf32>
    %156 = vector.shape_cast %155 : vector<1x8x128xf32> to vector<8x128xf32>
    %c0_88 = arith.constant 0 : index
    %c0_89 = arith.constant 0 : index
    %157 = vector.load %arg7[%c0_88, %c0_89] : memref<8x128xf32, #tpu.memory_space<vmem>>, vector<8x128xf32>
    %158 = arith.truncf %157 : vector<8x128xf32> to vector<8x128xbf16>
    %cst_90 = arith.constant dense<0.000000e+00> : vector<8x128xf32>
    %159 = tpu.matmul %158, %3, %cst_90 {dimension_numbers = #tpu.dot_dimension_numbers<[1], [0], [0], [1], [0, 0, 1, 1], [], []>} : vector<8x128xbf16>, vector<128x128xbf16>, vector<8x128xf32> -> vector<8x128xf32>
    %160 = arith.addf %156, %159 : vector<8x128xf32>
    %161 = arith.negf %160 : vector<8x128xf32>
    %162 = math.exp %161 : vector<8x128xf32>
    %cst_91 = arith.constant 1.000000e+00 : f32
    %163 = vector.broadcast %cst_91 : f32 to vector<8x128xf32>
    %164 = arith.addf %163, %162 : vector<8x128xf32>
    %165 = arith.divf %163, %164 : vector<8x128xf32>
    %166 = math.tanh %160 : vector<8x128xf32>
    %c0_92 = arith.constant 0 : index
    %c0_93 = arith.constant 0 : index
    %167 = vector.load %arg8[%c0_92, %c0_93] : memref<8x128xf32, #tpu.memory_space<vmem>>, vector<8x128xf32>
    %168 = arith.addf %167, %166 : vector<8x128xf32>
    %169 = arith.mulf %165, %168 : vector<8x128xf32>
    %170 = math.tanh %169 : vector<8x128xf32>
    %171 = arith.mulf %170, %165 : vector<8x128xf32>
    %c0_94 = arith.constant 0 : index
    %c0_95 = arith.constant 0 : index
    %172 = vector.load %arg8[%c0_94, %c0_95] : memref<8x128xf32, #tpu.memory_space<vmem>>, vector<8x128xf32>
    tpu.vector_store %arg8[%c0_94, %c0_95], %169 {strides = array<i32>} : memref<8x128xf32, #tpu.memory_space<vmem>>, vector<8x128xf32>,
    %c0_96 = arith.constant 0 : index
    %c0_97 = arith.constant 0 : index
    %173 = vector.load %arg7[%c0_96, %c0_97] : memref<8x128xf32, #tpu.memory_space<vmem>>, vector<8x128xf32>
    tpu.vector_store %arg7[%c0_96, %c0_97], %171 {strides = array<i32>} : memref<8x128xf32, #tpu.memory_space<vmem>>, vector<8x128xf32>,
    %174 = arith.truncf %171 : vector<8x128xf32> to vector<8x128xbf16>
    %175 = arith.index_cast %c6_i32 : i32 to index
    %c0_98 = arith.constant 0 : index
    %c0_99 = arith.constant 0 : index
    %176 = vector.load %arg5[%175, %c0_98, %c0_99] : memref<8x8x128xbf16, #tpu.memory_space<vmem>>, vector<1x8x128xbf16>
    %177 = vector.shape_cast %176 : vector<1x8x128xbf16> to vector<8x128xbf16>
    %178 = vector.shape_cast %174 : vector<8x128xbf16> to vector<1x8x128xbf16>
    tpu.vector_store %arg5[%175, %c0_98, %c0_99], %178 {strides = array<i32>} : memref<8x8x128xbf16, #tpu.memory_space<vmem>>, vector<1x8x128xbf16>,
    %c7_i32 = arith.constant 7 : i32
    %179 = arith.index_cast %c7_i32 : i32 to index
    %c0_100 = arith.constant 0 : index
    %c0_101 = arith.constant 0 : index
    %180 = vector.load %arg1[%179, %c0_100, %c0_101] : memref<8x8x128xf32, #tpu.memory_space<vmem>>, vector<1x8x128xf32>
    %181 = vector.shape_cast %180 : vector<1x8x128xf32> to vector<8x128xf32>
    %c0_102 = arith.constant 0 : index
    %c0_103 = arith.constant 0 : index
    %182 = vector.load %arg7[%c0_102, %c0_103] : memref<8x128xf32, #tpu.memory_space<vmem>>, vector<8x128xf32>
    %183 = arith.truncf %182 : vector<8x128xf32> to vector<8x128xbf16>
    %cst_104 = arith.constant dense<0.000000e+00> : vector<8x128xf32>
    %184 = tpu.matmul %183, %3, %cst_104 {dimension_numbers = #tpu.dot_dimension_numbers<[1], [0], [0], [1], [0, 0, 1, 1], [], []>} : vector<8x128xbf16>, vector<128x128xbf16>, vector<8x128xf32> -> vector<8x128xf32>
    %185 = arith.addf %181, %184 : vector<8x128xf32>
    %186 = arith.negf %185 : vector<8x128xf32>
    %187 = math.exp %186 : vector<8x128xf32>
    %cst_105 = arith.constant 1.000000e+00 : f32
    %188 = vector.broadcast %cst_105 : f32 to vector<8x128xf32>
    %189 = arith.addf %188, %187 : vector<8x128xf32>
    %190 = arith.divf %188, %189 : vector<8x128xf32>
    %191 = math.tanh %185 : vector<8x128xf32>
    %c0_106 = arith.constant 0 : index
    %c0_107 = arith.constant 0 : index
    %192 = vector.load %arg8[%c0_106, %c0_107] : memref<8x128xf32, #tpu.memory_space<vmem>>, vector<8x128xf32>
    %193 = arith.addf %192, %191 : vector<8x128xf32>
    %194 = arith.mulf %190, %193 : vector<8x128xf32>
    %195 = math.tanh %194 : vector<8x128xf32>
    %196 = arith.mulf %195, %190 : vector<8x128xf32>
    %c0_108 = arith.constant 0 : index
    %c0_109 = arith.constant 0 : index
    %197 = vector.load %arg8[%c0_108, %c0_109] : memref<8x128xf32, #tpu.memory_space<vmem>>, vector<8x128xf32>
    tpu.vector_store %arg8[%c0_108, %c0_109], %194 {strides = array<i32>} : memref<8x128xf32, #tpu.memory_space<vmem>>, vector<8x128xf32>,
    %c0_110 = arith.constant 0 : index
    %c0_111 = arith.constant 0 : index
    %198 = vector.load %arg7[%c0_110, %c0_111] : memref<8x128xf32, #tpu.memory_space<vmem>>, vector<8x128xf32>
    tpu.vector_store %arg7[%c0_110, %c0_111], %196 {strides = array<i32>} : memref<8x128xf32, #tpu.memory_space<vmem>>, vector<8x128xf32>,
    %199 = arith.truncf %196 : vector<8x128xf32> to vector<8x128xbf16>
    %200 = arith.index_cast %c7_i32 : i32 to index
    %c0_112 = arith.constant 0 : index
    %c0_113 = arith.constant 0 : index
    %201 = vector.load %arg5[%200, %c0_112, %c0_113] : memref<8x8x128xbf16, #tpu.memory_space<vmem>>, vector<1x8x128xbf16>
    %202 = vector.shape_cast %201 : vector<1x8x128xbf16> to vector<8x128xbf16>
    %203 = vector.shape_cast %199 : vector<8x128xbf16> to vector<1x8x128xbf16>
    tpu.vector_store %arg5[%200, %c0_112, %c0_113], %203 {strides = array<i32>} : memref<8x8x128xbf16, #tpu.memory_space<vmem>>, vector<1x8x128xbf16>,
    %c8_i32 = arith.constant 8 : i32
    %c0_i32_114 = arith.constant 0 : i32
    %204 = arith.cmpi eq, %arg0, %c0_i32_114 : i32
    %205 = arith.extui %204 : i1 to i32
    %c0_i32_115 = arith.constant 0 : i32
    %206 = arith.cmpi ne, %205, %c0_i32_115 : i32
    scf.if %206 {
      %c0_116 = arith.constant 0 : index
      %c0_117 = arith.constant 0 : index
      %207 = vector.load %arg8[%c0_116, %c0_117] : memref<8x128xf32, #tpu.memory_space<vmem>>, vector<8x128xf32>
      %c0_118 = arith.constant 0 : index
      %c0_119 = arith.constant 0 : index
      %208 = vector.load %arg6[%c0_118, %c0_119] : memref<8x128xf32, #tpu.memory_space<vmem>>, vector<8x128xf32>
      tpu.vector_store %arg6[%c0_118, %c0_119], %207 {strides = array<i32>} : memref<8x128xf32, #tpu.memory_space<vmem>>, vector<8x128xf32>,
    } else {
    }
    return
  }
  func.func @transform_0(%arg0: i32) -> (i32, i32, i32) {
    %c0_i32 = arith.constant 0 : i32
    %c0_i32_0 = arith.constant 0 : i32
    %c0_i32_1 = arith.constant 0 : i32
    return %arg0, %c0_i32, %c0_i32_0 : i32, i32, i32
  }
  func.func @transform_1(%arg0: i32) -> (i32, i32) {
    %c0_i32 = arith.constant 0 : i32
    %c0_i32_0 = arith.constant 0 : i32
    %c0_i32_1 = arith.constant 0 : i32
    return %c0_i32, %c0_i32_0 : i32, i32
  }
  func.func @transform_2(%arg0: i32) -> (i32, i32) {
    %c0_i32 = arith.constant 0 : i32
    %c0_i32_0 = arith.constant 0 : i32
    %c0_i32_1 = arith.constant 0 : i32
    return %c0_i32, %c0_i32_0 : i32, i32
  }
  func.func @transform_3(%arg0: i32) -> (i32, i32) {
    %c0_i32 = arith.constant 0 : i32
    %c0_i32_0 = arith.constant 0 : i32
    %c0_i32_1 = arith.constant 0 : i32
    return %c0_i32, %c0_i32_0 : i32, i32
  }
  func.func @transform_4(%arg0: i32) -> (i32, i32, i32) {
    %c0_i32 = arith.constant 0 : i32
    %c0_i32_0 = arith.constant 0 : i32
    %c0_i32_1 = arith.constant 0 : i32
    return %arg0, %c0_i32, %c0_i32_0 : i32, i32, i32
  }
  func.func @transform_5(%arg0: i32) -> (i32, i32) {
    %c0_i32 = arith.constant 0 : i32
    %c0_i32_0 = arith.constant 0 : i32
    %c0_i32_1 = arith.constant 0 : i32
    return %c0_i32, %c0_i32_0 : i32, i32
  }
}

</mosaic_0001>

<bundles_post_ra>
// kernel: tpu_custom_call.1
= control target key start
LH: loop header
LB: loop body
LE: loop exit
PB: predicated region body
PF: predicated region fallthrough
CT: control target
= control target key end

     0   :  { %11 = vsyncpa [#allocation5], 0  ;;  %s1383_s0 = inlined_call_operand.hbm [shape: f32[8,8,128], index: 0, kind: input, shape index: {}]   ;;  %s1384_s1 = inlined_call_operand.hbm [shape: bf16[128,128], index: 1, kind: input, shape index: {}]   ;;  %s1385_s2 = inlined_call_operand.hbm [shape: f32[8,128], index: 2, kind: input, shape index: {}]   ;;  %s1386_s3 = inlined_call_operand.vmem [shape: f32[8,128], index: 3, kind: input, shape index: {}]   ;;  %s1387_s4 = inlined_call_operand.hbm [shape: bf16[8,8,128], index: 4, kind: output, shape index: {0}]   ;;  %s1388_s5 = inlined_call_operand.hbm [shape: f32[8,128], index: 5, kind: output, shape index: {1}]  }
   0x1   :  { %12 = vsyncpa [#allocation8], 0 }
   0x2   :  { %13 = vsyncpa [#allocation6], 0 }
   0x3   :  { %14 = vsyncpa [#allocation12], 0  ;;  %s1113_s18 = smov [#allocation7]   ;;  %s995_s22 = scalar_lea.hbm %s1384_s1, 1024 }
   0x4   :  { %s32_s19 = sshll.u32 %s1113_s18, 4  ;;  %p996_p0 = scmp.ne.s32.totalorder %s1384_s1, %s995_s22  ;;  %s33_s19 = int_to_ptr.vmem [resolvable:$true] %s32_s19 }
   0x5   :  { %p999_p1 = scmp.lt.u32.totalorder %s995_s22, %s1384_s1 }
   0x7   :  { %p1001_p2 = pnand %p999_p1, %p996_p0 }
   0x9   :  { %1004 = shalt.err (!%p1001_p2)
}
   0xa   :  { %s1005_s27 = scalar_lea.vmem %s33_s19, 1024  ;;  %p1010_p4 = scmp.lt.s32.totalorder %s33_s19, %s33_s19 }
   0xb   :  { %p1006_p3 = scmp.ne.s32.totalorder %s33_s19, %s1005_s27  ;;  %p1011_p5 = scmp.lt.s32.totalorder %s1005_s27, %s1005_s27 }
   0xd   :  { %p1012_p6 = por %p1011_p5, %p1010_p4 }
   0xf   :  { %p1013_p7 = pnand %p1012_p6, %p1006_p3 }
  0x11   :  { %1016 = shalt.err (!%p1013_p7)
}
  0x12   :  { %s1114_s28 = smov 64   ;;  %s1115_s29 = smov 4  }
  0x13   :  { %38 = dma.hbm_to_vmem [thread:$0]  %s1384_s1, 1024, %s33_s19, [#allocation8], %s1114_s28, %s1114_s28, %s1115_s29  }
  0x14   :  { %s1116_s7 = smov [#allocation4]   ;;  %s1017_s11 = scalar_lea.hbm %s1383_s0, 1024 }
  0x15   :  { %s20_s8 = sshll.u32 %s1116_s7, 4  ;;  %p1018_p8 = scmp.ne.s32.totalorder %s1383_s0, %s1017_s11  ;;  %s21_s8 = int_to_ptr.vmem [resolvable:$true] %s20_s8 }
  0x16   :  { %p1021_p9 = scmp.lt.u32.totalorder %s1017_s11, %s1383_s0 }
  0x18   :  { %p1023_p10 = pnand %p1021_p9, %p1018_p8 }
  0x1a   :  { %1026 = shalt.err (!%p1023_p10)
}
  0x1b   :  { %s1027_s16 = scalar_lea.vmem %s21_s8, 1024  ;;  %p1032_p12 = scmp.lt.s32.totalorder %s21_s8, %s21_s8 }
  0x1c   :  { %p1028_p11 = scmp.ne.s32.totalorder %s21_s8, %s1027_s16  ;;  %p1033_p13 = scmp.lt.s32.totalorder %s1027_s16, %s1027_s16 }
  0x1e   :  { %p1034_p0 = por %p1033_p13, %p1032_p12 }
  0x20   :  { %p1035_p1 = pnand %p1034_p0, %p1028_p11 }
  0x22   :  { %1038 = shalt.err (!%p1035_p1)
}
  0x23   :  { %s1117_s1 = smov 128   ;;  %s1118_s17 = smov 8  }
  0x24   :  { %26 = dma.hbm_to_vmem [thread:$0]  %s1383_s0, 1024, %s21_s8, [#allocation5], %s1117_s1, %s1117_s1, %s1118_s17  }
  0x25   :  { %s1119_s20 = smov [#allocation9]   ;;  %s1039_s24 = scalar_lea.hbm %s1385_s2, 128 }
  0x26   :  { %s45_s21 = sshll.u32 %s1119_s20, 4  ;;  %p1040_p2 = scmp.ne.s32.totalorder %s1385_s2, %s1039_s24  ;;  %s46_s21 = int_to_ptr.vmem [resolvable:$true] %s45_s21 }
  0x27   :  { %p1043_p3 = scmp.lt.u32.totalorder %s1039_s24, %s1385_s2 }
  0x29   :  { %p1045_p4 = pnand %p1043_p3, %p1040_p2 }
  0x2b   :  { %1048 = shalt.err (!%p1045_p4)
}
  0x2c   :  { %s1049_s6 = scalar_lea.vmem %s46_s21, 128  ;;  %p1054_p6 = scmp.lt.s32.totalorder %s46_s21, %s46_s21 }
  0x2d   :  { %p1050_p5 = scmp.ne.s32.totalorder %s46_s21, %s1049_s6  ;;  %p1055_p7 = scmp.lt.s32.totalorder %s1049_s6, %s1049_s6 }
  0x2f   :  { %p1056_p8 = por %p1055_p7, %p1054_p6 }
  0x31   :  { %p1057_p9 = pnand %p1056_p8, %p1050_p5 }
  0x33   :  { %1060 = shalt.err (!%p1057_p9)
}
  0x34   :  { %48 = dma.hbm_to_vmem [thread:$0]  %s1385_s2, 128, %s46_s21, [#allocation8]  }
  0x35   :  { %1105 = dma.done.wait [#allocation5], 1024  }
  0x36   :  { %1106 = vsyncadd [#allocation5], 4294966272 }
  0x37   :  { %1107 = dma.done.wait [#allocation8], 1152  }
  0x38   :  { %1108 = vsyncadd [#allocation8], 4294966144  ;;  %v1120_v0 = vmov 0.0   ;;  %vm1121_vm0 = vmmov 0   ;;  %v1199_v1 = vld [vmem:[#allocation7] sm:$0xff]   ;;  %v1202_v2 = vld [vmem:[#allocation7 + $0x8] sm:$0xff]  }
  0x39   :  { %752 = vmatprep.subr.bf16.mxu0 %v1120_v0  ;;  %768 = vmatprep.mubr.msk.bf16.mxu0 %vm1121_vm0, %v1120_v0  ;;  %v1208_v3 = vld [vmem:[#allocation7 + $0x10] sm:$0xff]   ;;  %v1214_v4 = vld [vmem:[#allocation7 + $0x18] sm:$0xff]   ;;  %v1220_v5 = vld [vmem:[#allocation7 + $0x20] sm:$0xff]  }
  0x3a   :  { %772 = vmatprep.subr.bf16.mxu1 %v1120_v0  ;;  %788 = vmatprep.mubr.msk.bf16.mxu1 %vm1121_vm0, %v1120_v0  ;;  %v1226_v6 = vld [vmem:[#allocation7 + $0x28] sm:$0xff]   ;;  %v1232_v7 = vld [vmem:[#allocation7 + $0x30] sm:$0xff]   ;;  %v1238_v8 = vld [vmem:[#allocation7 + $0x38] sm:$0xff]  }
  0x3b   :  { %753 = vmatpush3.bf16.msra.mxu0 %v1199_v1  ;;  %773 = vmatpush3.bf16.msra.mxu1 %v1199_v1  ;;  %v65_v9 = vld [vmem:[#allocation9] sm:$0xff]  ;;  %v194_v28 = vld [vmem:[#allocation4 + $0x8] sm:$0xff]  ;;  %v256_v44 = vld [vmem:[#allocation4 + $0x10] sm:$0xff] }
  0x3c   :  { %754 = vmatprep.subr.bf16.mxu0 %v1120_v0  ;;  %774 = vmatprep.subr.bf16.mxu1 %v1120_v0  ;;  %v87_v10 = vpack.c.bf16 %v65_v9, %v65_v9  ;;  %v85_v11 = vld [vmem:[#allocation4] sm:$0xff]  ;;  %v318_v60 = vld [vmem:[#allocation4 + $0x18] sm:$0xff] }
  0x3d   :  { %v67_v21 = vld [vmem:[%s1386_s3] sm:$0xff]  ;;  %s1122_s3 = smov [#allocation11]  }
  0x3e   :  { %s650_s9 = sshll.u32 %s1122_s3, 4  ;;  %s651_s9 = int_to_ptr.vmem [resolvable:$true] %s650_s9 }
  0x3f   :  { %755 = vmatpush3.bf16.msra.mxu0 %v1202_v2  ;;  %775 = vmatpush3.bf16.msra.mxu1 %v1202_v2  ;;  %s1061_s10 = scalar_lea.vmem %s651_s9, 128  ;;  %p1066_p11 = scmp.lt.s32.totalorder %s651_s9, %s651_s9 }
  0x40   :  { %756 = vmatprep.subr.bf16.mxu0 %v1120_v0  ;;  %776 = vmatprep.subr.bf16.mxu1 %v1120_v0  ;;  %p1062_p10 = scmp.ne.s32.totalorder %s651_s9, %s1061_s10  ;;  %p1067_p12 = scmp.lt.s32.totalorder %s1061_s10, %s1061_s10 }
  0x42   :  { %p1068_p13 = por %p1067_p12, %p1066_p11 }
  0x43   :  { %757 = vmatpush3.bf16.msra.mxu0 %v1208_v3  ;;  %777 = vmatpush3.bf16.msra.mxu1 %v1208_v3 }
  0x44   :  { %758 = vmatprep.subr.bf16.mxu0 %v1120_v0  ;;  %778 = vmatprep.subr.bf16.mxu1 %v1120_v0  ;;  %p1069_p0 = pnand %p1068_p13, %p1062_p10 }
  0x47   :  { %759 = vmatpush3.bf16.msra.mxu0 %v1214_v4  ;;  %779 = vmatpush3.bf16.msra.mxu1 %v1214_v4 }
  0x48   :  { %760 = vmatprep.subr.bf16.mxu0 %v1120_v0  ;;  %780 = vmatprep.subr.bf16.mxu1 %v1120_v0 }
  0x4b   :  { %761 = vmatpush3.bf16.msra.mxu0 %v1220_v5  ;;  %781 = vmatpush3.bf16.msra.mxu1 %v1220_v5 }
  0x4c   :  { %762 = vmatprep.subr.bf16.mxu0 %v1120_v0  ;;  %782 = vmatprep.subr.bf16.mxu1 %v1120_v0 }
  0x4f   :  { %763 = vmatpush3.bf16.msra.mxu0 %v1226_v6  ;;  %783 = vmatpush3.bf16.msra.mxu1 %v1226_v6 }
  0x50   :  { %764 = vmatprep.subr.bf16.mxu0 %v1120_v0  ;;  %784 = vmatprep.subr.bf16.mxu1 %v1120_v0 }
  0x53   :  { %765 = vmatpush3.bf16.msra.mxu0 %v1232_v7  ;;  %785 = vmatpush3.bf16.msra.mxu1 %v1232_v7 }
  0x54   :  { %766 = vmatprep.subr.bf16.mxu0 %v1120_v0  ;;  %786 = vmatprep.subr.bf16.mxu1 %v1120_v0 }
  0x57   :  { %767 = vmatpush3.bf16.msra.mxu0 %v1238_v8  ;;  %787 = vmatpush3.bf16.msra.mxu1 %v1238_v8 }
  0x58   :  { %792 = vmatprep.subr.bf16.mxu0 %v1120_v0  ;;  %812 = vmatprep.subr.bf16.mxu1 %v1120_v0 }
  0x5a   :  { %769 = vmatmul.mubr.bf16.vlgmr.msra.gmra.mrb[0].mxu0 %v87_v10 }
  0x5b   :  { %793 = vmatpush3.bf16.msra.mxu0 %v1199_v1  ;;  %808 = vmatprep.mubr.msk.bf16.mxu0 %vm1121_vm0, %v1120_v0 }
  0x5c   :  { %794 = vmatprep.subr.bf16.mxu0 %v1120_v0 }
  0x5f   :  { %795 = vmatpush3.bf16.msra.mxu0 %v1202_v2 }
  0x60   :  { %796 = vmatprep.subr.bf16.mxu0 %v1120_v0 }
  0x63   :  { %797 = vmatpush3.bf16.msra.mxu0 %v1208_v3 }
  0x64   :  { %798 = vmatprep.subr.bf16.mxu0 %v1120_v0 }
  0x67   :  { %799 = vmatpush3.bf16.msra.mxu0 %v1214_v4 }
  0x68   :  { %800 = vmatprep.subr.bf16.mxu0 %v1120_v0 }
  0x6b   :  { %801 = vmatpush3.bf16.msra.mxu0 %v1220_v5 }
  0x6c   :  { %802 = vmatprep.subr.bf16.mxu0 %v1120_v0 }
  0x6f   :  { %803 = vmatpush3.bf16.msra.mxu0 %v1226_v6 }
  0x70   :  { %804 = vmatprep.subr.bf16.mxu0 %v1120_v0 }
  0x73   :  { %805 = vmatpush3.bf16.msra.mxu0 %v1232_v7 }
  0x74   :  { %806 = vmatprep.subr.bf16.mxu0 %v1120_v0 }
  0x77   :  { %807 = vmatpush3.bf16.msra.mxu0 %v1238_v8 }
  0x78   :  { %832 = vmatprep.subr.bf16.mxu0 %v1120_v0 }
 0x12d   :  { %v170_v12 = vpop.f32.mrb[0].mxu0 }
 0x12e   :  { %v176_v13 = vadd.f32 %v170_v12, %v85_v11  ;;  %v770_v14 = vpop.f32.mrb[1].mxu0 }
 0x12f   :  { %v173_v15 = vpop.f32.mrb[2].mxu0 }
 0x130   :  { %v672_v16 = vmul.f32 -1.442695, %v176_v13  ;;  %v771_v17 = vpop.f32.mrb[3].mxu0 }
 0x132   :  { %931 = vpow2.f32 %v672_v16 }
 0x133   :  { %933 = vtanh.f32 %v176_v13 }
 0x13c   :  { %v932_v18 = vpop.eup %931 }
 0x13d   :  { %v180_v19 = vadd.f32 1.0, %v932_v18  ;;  %v934_v20 = vpop.eup %933 }
 0x13e   :  { %v185_v22 = vadd.f32 %v934_v20, %v67_v21  ;;  %v380_v21 = vld [vmem:[#allocation4 + $0x20] sm:$0xff] }
 0x13f   :  { %935 = vrcp.f32 %v180_v19 }
 0x149   :  { %v936_v23 = vpop.eup %935 }
 0x14a   :  { %v186_v24 = vmul.f32 %v936_v23, %v185_v22 }
 0x14c   :  { %937 = vtanh.f32 %v186_v24 }
 0x156   :  { %v938_v25 = vpop.eup %937 }
 0x157   :  { %v188_v26 = vmul.f32 %v938_v25, %v936_v23 }
 0x159   :  { %v191_v27 = vpack.c.bf16 %v188_v26, %v188_v26 }
 0x15b   :  { %192 = vst [vmem:[#allocation10] sm:$0xf] %v191_v27  ;;  %789 = vmatmul.mubr.bf16.vlgmr.msra.gmra.mrb[0].mxu1 %v191_v27 }
 0x15c   :  { %813 = vmatpush3.bf16.msra.mxu1 %v1199_v1  ;;  %828 = vmatprep.mubr.msk.bf16.mxu1 %vm1121_vm0, %v1120_v0 }
 0x15d   :  { %814 = vmatprep.subr.bf16.mxu1 %v1120_v0 }
 0x160   :  { %815 = vmatpush3.bf16.msra.mxu1 %v1202_v2 }
 0x161   :  { %816 = vmatprep.subr.bf16.mxu1 %v1120_v0 }
 0x164   :  { %817 = vmatpush3.bf16.msra.mxu1 %v1208_v3 }
 0x165   :  { %818 = vmatprep.subr.bf16.mxu1 %v1120_v0 }
 0x168   :  { %819 = vmatpush3.bf16.msra.mxu1 %v1214_v4 }
 0x169   :  { %820 = vmatprep.subr.bf16.mxu1 %v1120_v0 }
 0x16c   :  { %821 = vmatpush3.bf16.msra.mxu1 %v1220_v5 }
 0x16d   :  { %822 = vmatprep.subr.bf16.mxu1 %v1120_v0 }
 0x170   :  { %823 = vmatpush3.bf16.msra.mxu1 %v1226_v6 }
 0x171   :  { %824 = vmatprep.subr.bf16.mxu1 %v1120_v0 }
 0x174   :  { %825 = vmatpush3.bf16.msra.mxu1 %v1232_v7 }
 0x175   :  { %826 = vmatprep.subr.bf16.mxu1 %v1120_v0 }
 0x178   :  { %827 = vmatpush3.bf16.msra.mxu1 %v1238_v8 }
 0x179   :  { %852 = vmatprep.subr.bf16.mxu1 %v1120_v0 }
 0x22e   :  { %v231_v29 = vpop.f32.mrb[0].mxu1 }
 0x22f   :  { %v237_v30 = vadd.f32 %v231_v29, %v194_v28  ;;  %v790_v31 = vpop.f32.mrb[1].mxu1 }
 0x230   :  { %v234_v32 = vpop.f32.mrb[2].mxu1 }
 0x231   :  { %v673_v33 = vmul.f32 -1.442695, %v237_v30  ;;  %v791_v34 = vpop.f32.mrb[3].mxu1 }
 0x233   :  { %939 = vpow2.f32 %v673_v33 }
 0x234   :  { %941 = vtanh.f32 %v237_v30 }
 0x23d   :  { %v940_v35 = vpop.eup %939 }
 0x23e   :  { %v241_v36 = vadd.f32 1.0, %v940_v35  ;;  %v942_v37 = vpop.eup %941 }
 0x23f   :  { %v246_v38 = vadd.f32 %v942_v37, %v186_v24 }
 0x240   :  { %943 = vrcp.f32 %v241_v36 }
 0x24a   :  { %v944_v39 = vpop.eup %943 }
 0x24b   :  { %v247_v40 = vmul.f32 %v944_v39, %v246_v38 }
 0x24d   :  { %945 = vtanh.f32 %v247_v40 }
 0x257   :  { %v946_v41 = vpop.eup %945 }
 0x258   :  { %v249_v42 = vmul.f32 %v946_v41, %v944_v39 }
 0x25a   :  { %v252_v43 = vpack.c.bf16 %v249_v42, %v249_v42 }
 0x25c   :  { %254 = vst [vmem:[#allocation10 + $0x4] sm:$0xf] %v252_v43  ;;  %809 = vmatmul.mubr.bf16.vlgmr.msra.gmra.mrb[4].mxu0 %v252_v43 }
 0x25d   :  { %833 = vmatpush3.bf16.msra.mxu0 %v1199_v1  ;;  %848 = vmatprep.mubr.msk.bf16.mxu0 %vm1121_vm0, %v1120_v0 }
 0x25e   :  { %834 = vmatprep.subr.bf16.mxu0 %v1120_v0 }
 0x261   :  { %835 = vmatpush3.bf16.msra.mxu0 %v1202_v2 }
 0x262   :  { %836 = vmatprep.subr.bf16.mxu0 %v1120_v0 }
 0x265   :  { %837 = vmatpush3.bf16.msra.mxu0 %v1208_v3 }
 0x266   :  { %838 = vmatprep.subr.bf16.mxu0 %v1120_v0 }
 0x269   :  { %839 = vmatpush3.bf16.msra.mxu0 %v1214_v4 }
 0x26a   :  { %840 = vmatprep.subr.bf16.mxu0 %v1120_v0 }
 0x26d   :  { %841 = vmatpush3.bf16.msra.mxu0 %v1220_v5 }
 0x26e   :  { %842 = vmatprep.subr.bf16.mxu0 %v1120_v0 }
 0x271   :  { %843 = vmatpush3.bf16.msra.mxu0 %v1226_v6 }
 0x272   :  { %844 = vmatprep.subr.bf16.mxu0 %v1120_v0 }
 0x275   :  { %845 = vmatpush3.bf16.msra.mxu0 %v1232_v7 }
 0x276   :  { %846 = vmatprep.subr.bf16.mxu0 %v1120_v0 }
 0x279   :  { %847 = vmatpush3.bf16.msra.mxu0 %v1238_v8 }
 0x27a   :  { %872 = vmatprep.subr.bf16.mxu0 %v1120_v0 }
 0x32f   :  { %v293_v45 = vpop.f32.mrb[4].mxu0 }
 0x330   :  { %v299_v46 = vadd.f32 %v293_v45, %v256_v44  ;;  %v810_v47 = vpop.f32.mrb[5].mxu0  ;;  %v504_v44 = vld [vmem:[#allocation4 + $0x30] sm:$0xff] }
 0x331   :  { %v296_v48 = vpop.f32.mrb[6].mxu0 }
 0x332   :  { %v674_v49 = vmul.f32 -1.442695, %v299_v46  ;;  %v811_v50 = vpop.f32.mrb[7].mxu0 }
 0x334   :  { %947 = vpow2.f32 %v674_v49 }
 0x335   :  { %949 = vtanh.f32 %v299_v46 }
 0x33e   :  { %v948_v51 = vpop.eup %947 }
 0x33f   :  { %v303_v52 = vadd.f32 1.0, %v948_v51  ;;  %v950_v53 = vpop.eup %949 }
 0x340   :  { %v308_v54 = vadd.f32 %v950_v53, %v247_v40 }
 0x341   :  { %951 = vrcp.f32 %v303_v52 }
 0x34b   :  { %v952_v55 = vpop.eup %951 }
 0x34c   :  { %v309_v56 = vmul.f32 %v952_v55, %v308_v54 }
 0x34e   :  { %953 = vtanh.f32 %v309_v56 }
 0x358   :  { %v954_v57 = vpop.eup %953 }
 0x359   :  { %v311_v58 = vmul.f32 %v954_v57, %v952_v55 }
 0x35b   :  { %v314_v59 = vpack.c.bf16 %v311_v58, %v311_v58 }
 0x35d   :  { %316 = vst [vmem:[#allocation10 + $0x8] sm:$0xf] %v314_v59  ;;  %829 = vmatmul.mubr.bf16.vlgmr.msra.gmra.mrb[4].mxu1 %v314_v59 }
 0x35e   :  { %853 = vmatpush3.bf16.msra.mxu1 %v1199_v1  ;;  %868 = vmatprep.mubr.msk.bf16.mxu1 %vm1121_vm0, %v1120_v0 }
 0x35f   :  { %854 = vmatprep.subr.bf16.mxu1 %v1120_v0 }
 0x362   :  { %855 = vmatpush3.bf16.msra.mxu1 %v1202_v2 }
 0x363   :  { %856 = vmatprep.subr.bf16.mxu1 %v1120_v0 }
 0x366   :  { %857 = vmatpush3.bf16.msra.mxu1 %v1208_v3 }
 0x367   :  { %858 = vmatprep.subr.bf16.mxu1 %v1120_v0 }
 0x36a   :  { %859 = vmatpush3.bf16.msra.mxu1 %v1214_v4 }
 0x36b   :  { %860 = vmatprep.subr.bf16.mxu1 %v1120_v0 }
 0x36e   :  { %861 = vmatpush3.bf16.msra.mxu1 %v1220_v5 }
 0x36f   :  { %862 = vmatprep.subr.bf16.mxu1 %v1120_v0 }
 0x372   :  { %863 = vmatpush3.bf16.msra.mxu1 %v1226_v6 }
 0x373   :  { %864 = vmatprep.subr.bf16.mxu1 %v1120_v0 }
 0x376   :  { %865 = vmatpush3.bf16.msra.mxu1 %v1232_v7 }
 0x377   :  { %866 = vmatprep.subr.bf16.mxu1 %v1120_v0 }
 0x37a   :  { %867 = vmatpush3.bf16.msra.mxu1 %v1238_v8 }
 0x37b   :  { %892 = vmatprep.subr.bf16.mxu1 %v1120_v0 }
 0x430   :  { %v355_v61 = vpop.f32.mrb[4].mxu1 }
 0x431   :  { %v361_v62 = vadd.f32 %v355_v61, %v318_v60  ;;  %v830_v63 = vpop.f32.mrb[5].mxu1  ;;  %v566_v60 = vld [vmem:[#allocation4 + $0x38] sm:$0xff] }
 0x432   :  { %v358_v9 = vpop.f32.mrb[6].mxu1 }
 0x433   :  { %v675_v10 = vmul.f32 -1.442695, %v361_v62  ;;  %v831_v11 = vpop.f32.mrb[7].mxu1 }
 0x435   :  { %955 = vpow2.f32 %v675_v10 }
 0x436   :  { %957 = vtanh.f32 %v361_v62 }
 0x43f   :  { %v956_v12 = vpop.eup %955 }
 0x440   :  { %v365_v13 = vadd.f32 1.0, %v956_v12  ;;  %v958_v14 = vpop.eup %957 }
 0x441   :  { %v370_v15 = vadd.f32 %v958_v14, %v309_v56 }
 0x442   :  { %959 = vrcp.f32 %v365_v13 }
 0x44c   :  { %v960_v16 = vpop.eup %959 }
 0x44d   :  { %v371_v17 = vmul.f32 %v960_v16, %v370_v15 }
 0x44f   :  { %961 = vtanh.f32 %v371_v17 }
 0x459   :  { %v962_v18 = vpop.eup %961 }
 0x45a   :  { %v373_v19 = vmul.f32 %v962_v18, %v960_v16 }
 0x45c   :  { %v376_v20 = vpack.c.bf16 %v373_v19, %v373_v19 }
 0x45e   :  { %378 = vst [vmem:[#allocation10 + $0xc] sm:$0xf] %v376_v20  ;;  %849 = vmatmul.mubr.bf16.vlgmr.msra.gmra.mrb[8].mxu0 %v376_v20 }
 0x45f   :  { %873 = vmatpush3.bf16.msra.mxu0 %v1199_v1  ;;  %888 = vmatprep.mubr.msk.bf16.mxu0 %vm1121_vm0, %v1120_v0 }
 0x460   :  { %874 = vmatprep.subr.bf16.mxu0 %v1120_v0 }
 0x463   :  { %875 = vmatpush3.bf16.msra.mxu0 %v1202_v2 }
 0x464   :  { %876 = vmatprep.subr.bf16.mxu0 %v1120_v0 }
 0x467   :  { %877 = vmatpush3.bf16.msra.mxu0 %v1208_v3 }
 0x468   :  { %878 = vmatprep.subr.bf16.mxu0 %v1120_v0 }
 0x46b   :  { %879 = vmatpush3.bf16.msra.mxu0 %v1214_v4 }
 0x46c   :  { %880 = vmatprep.subr.bf16.mxu0 %v1120_v0 }
 0x46f   :  { %881 = vmatpush3.bf16.msra.mxu0 %v1220_v5 }
 0x470   :  { %882 = vmatprep.subr.bf16.mxu0 %v1120_v0 }
 0x473   :  { %883 = vmatpush3.bf16.msra.mxu0 %v1226_v6 }
 0x474   :  { %884 = vmatprep.subr.bf16.mxu0 %v1120_v0 }
 0x477   :  { %885 = vmatpush3.bf16.msra.mxu0 %v1232_v7 }
 0x478   :  { %886 = vmatprep.subr.bf16.mxu0 %v1120_v0 }
 0x47b   :  { %887 = vmatpush3.bf16.msra.mxu0 %v1238_v8 }
 0x531   :  { %v417_v22 = vpop.f32.mrb[8].mxu0 }
 0x532   :  { %v423_v23 = vadd.f32 %v417_v22, %v380_v21  ;;  %v850_v24 = vpop.f32.mrb[9].mxu0 }
 0x533   :  { %v420_v25 = vpop.f32.mrb[10].mxu0 }
 0x534   :  { %v676_v26 = vmul.f32 -1.442695, %v423_v23  ;;  %v851_v27 = vpop.f32.mrb[11].mxu0 }
 0x536   :  { %963 = vpow2.f32 %v676_v26 }
 0x537   :  { %965 = vtanh.f32 %v423_v23 }
 0x540   :  { %v964_v28 = vpop.eup %963 }
 0x541   :  { %v427_v29 = vadd.f32 1.0, %v964_v28  ;;  %v966_v30 = vpop.eup %965 }
 0x542   :  { %v432_v31 = vadd.f32 %v966_v30, %v371_v17 }
 0x543   :  { %967 = vrcp.f32 %v427_v29 }
 0x54d   :  { %v968_v32 = vpop.eup %967 }
 0x54e   :  { %v433_v33 = vmul.f32 %v968_v32, %v432_v31 }
 0x550   :  { %969 = vtanh.f32 %v433_v33 }
 0x55a   :  { %v970_v34 = vpop.eup %969 }
 0x55b   :  { %v435_v35 = vmul.f32 %v970_v34, %v968_v32 }
 0x55d   :  { %v438_v36 = vpack.c.bf16 %v435_v35, %v435_v35 }
 0x55f   :  { %440 = vst [vmem:[#allocation10 + $0x10] sm:$0xf] %v438_v36  ;;  %869 = vmatmul.mubr.bf16.vlgmr.msra.gmra.mrb[8].mxu1 %v438_v36 }
 0x560   :  { %893 = vmatpush3.bf16.msra.mxu1 %v1199_v1  ;;  %908 = vmatprep.mubr.msk.bf16.mxu1 %vm1121_vm0, %v1120_v0  ;;  %v442_v1 = vld [vmem:[#allocation4 + $0x28] sm:$0xff] }
 0x561   :  { %894 = vmatprep.subr.bf16.mxu1 %v1120_v0 }
 0x564   :  { %895 = vmatpush3.bf16.msra.mxu1 %v1202_v2 }
 0x565   :  { %896 = vmatprep.subr.bf16.mxu1 %v1120_v0 }
 0x568   :  { %897 = vmatpush3.bf16.msra.mxu1 %v1208_v3 }
 0x569   :  { %898 = vmatprep.subr.bf16.mxu1 %v1120_v0 }
 0x56c   :  { %899 = vmatpush3.bf16.msra.mxu1 %v1214_v4 }
 0x56d   :  { %900 = vmatprep.subr.bf16.mxu1 %v1120_v0 }
 0x570   :  { %901 = vmatpush3.bf16.msra.mxu1 %v1220_v5 }
 0x571   :  { %902 = vmatprep.subr.bf16.mxu1 %v1120_v0 }
 0x574   :  { %903 = vmatpush3.bf16.msra.mxu1 %v1226_v6 }
 0x575   :  { %904 = vmatprep.subr.bf16.mxu1 %v1120_v0 }
 0x578   :  { %905 = vmatpush3.bf16.msra.mxu1 %v1232_v7 }
 0x579   :  { %906 = vmatprep.subr.bf16.mxu1 %v1120_v0 }
 0x57c   :  { %907 = vmatpush3.bf16.msra.mxu1 %v1238_v8 }
 0x632   :  { %v479_v2 = vpop.f32.mrb[8].mxu1 }
 0x633   :  { %v485_v3 = vadd.f32 %v479_v2, %v442_v1  ;;  %v870_v4 = vpop.f32.mrb[9].mxu1 }
 0x634   :  { %v482_v37 = vpop.f32.mrb[10].mxu1 }
 0x635   :  { %v677_v38 = vmul.f32 -1.442695, %v485_v3  ;;  %v871_v39 = vpop.f32.mrb[11].mxu1 }
 0x637   :  { %971 = vpow2.f32 %v677_v38 }
 0x638   :  { %973 = vtanh.f32 %v485_v3 }
 0x641   :  { %v972_v5 = vpop.eup %971 }
 0x642   :  { %v489_v40 = vadd.f32 1.0, %v972_v5  ;;  %v974_v6 = vpop.eup %973 }
 0x643   :  { %v494_v41 = vadd.f32 %v974_v6, %v433_v33 }
 0x644   :  { %975 = vrcp.f32 %v489_v40 }
 0x64e   :  { %v976_v42 = vpop.eup %975 }
 0x64f   :  { %v495_v7 = vmul.f32 %v976_v42, %v494_v41 }
 0x651   :  { %977 = vtanh.f32 %v495_v7 }
 0x65b   :  { %v978_v0 = vpop.eup %977 }
 0x65c   :  { %v497_v43 = vmul.f32 %v978_v0, %v976_v42 }
 0x65e   :  { %v500_v8 = vpack.c.bf16 %v497_v43, %v497_v43 }
 0x660   :  { %502 = vst [vmem:[#allocation10 + $0x14] sm:$0xf] %v500_v8  ;;  %889 = vmatmul.mubr.bf16.vlgmr.msra.gmra.mrb[12].mxu0 %v500_v8 }
 0x733   :  { %v541_v45 = vpop.f32.mrb[12].mxu0 }
 0x734   :  { %v547_v46 = vadd.f32 %v541_v45, %v504_v44  ;;  %v890_v47 = vpop.f32.mrb[13].mxu0 }
 0x735   :  { %v544_v48 = vpop.f32.mrb[14].mxu0 }
 0x736   :  { %v678_v49 = vmul.f32 -1.442695, %v547_v46  ;;  %v891_v50 = vpop.f32.mrb[15].mxu0 }
 0x738   :  { %979 = vpow2.f32 %v678_v49 }
 0x739   :  { %981 = vtanh.f32 %v547_v46 }
 0x742   :  { %v980_v51 = vpop.eup %979 }
 0x743   :  { %v551_v52 = vadd.f32 1.0, %v980_v51  ;;  %v982_v53 = vpop.eup %981 }
 0x744   :  { %v556_v54 = vadd.f32 %v982_v53, %v495_v7 }
 0x745   :  { %983 = vrcp.f32 %v551_v52 }
 0x74f   :  { %v984_v55 = vpop.eup %983 }
 0x750   :  { %v557_v56 = vmul.f32 %v984_v55, %v556_v54 }
 0x752   :  { %985 = vtanh.f32 %v557_v56 }
 0x75c   :  { %v986_v57 = vpop.eup %985 }
 0x75d   :  { %v559_v58 = vmul.f32 %v986_v57, %v984_v55 }
 0x75f   :  { %v562_v59 = vpack.c.bf16 %v559_v58, %v559_v58 }
 0x761   :  { %564 = vst [vmem:[#allocation10 + $0x18] sm:$0xf] %v562_v59  ;;  %909 = vmatmul.mubr.bf16.vlgmr.msra.gmra.mrb[12].mxu1 %v562_v59 }
 0x834   :  { %v603_v61 = vpop.f32.mrb[12].mxu1 }
 0x835   :  { %v609_v62 = vadd.f32 %v603_v61, %v566_v60  ;;  %v910_v63 = vpop.f32.mrb[13].mxu1 }
 0x836   :  { %v606_v9 = vpop.f32.mrb[14].mxu1 }
 0x837   :  { %v679_v10 = vmul.f32 -1.442695, %v609_v62  ;;  %v911_v11 = vpop.f32.mrb[15].mxu1 }
 0x839   :  { %987 = vpow2.f32 %v679_v10 }
 0x83a   :  { %989 = vtanh.f32 %v609_v62 }
 0x843   :  { %v988_v12 = vpop.eup %987 }
 0x844   :  { %v613_v13 = vadd.f32 1.0, %v988_v12  ;;  %v990_v14 = vpop.eup %989 }
 0x845   :  { %v618_v15 = vadd.f32 %v990_v14, %v557_v56 }
 0x846   :  { %991 = vrcp.f32 %v613_v13 }
 0x850   :  { %v992_v16 = vpop.eup %991 }
 0x851   :  { %v619_v17 = vmul.f32 %v992_v16, %v618_v15 }
 0x853   :  { %993 = vtanh.f32 %v619_v17  ;;  %631 = vst [vmem:[#allocation11] sm:$0xff] %v619_v17 }
 0x854   :  { %1072 = shalt.err (!%p1069_p0)
}
 0x855   :  { %s1073_s13 = scalar_lea.hbm %s1388_s5, 128 }
 0x856   :  { %p1074_p1 = scmp.ne.s32.totalorder %s1388_s5, %s1073_s13  ;;  %p1077_p2 = scmp.lt.u32.totalorder %s1073_s13, %s1388_s5 }
 0x858   :  { %p1079_p3 = pnand %p1077_p2, %p1074_p1 }
 0x85a   :  { %1082 = shalt.err (!%p1079_p3)
}
 0x85b   :  { %653 = dma.vmem_to_hbm [thread:$0]  %s651_s9, 128, %s1388_s5, [#allocation12]  }
 0x85c   :  { %s1123_s19 = smov [#allocation10]  }
 0x85d   :  { %v994_v18 = vpop.eup %993  ;;  %s637_s20 = sshll.u32 %s1123_s19, 4  ;;  %s638_s20 = int_to_ptr.vmem [resolvable:$true] %s637_s20 }
 0x85e   :  { %v621_v19 = vmul.f32 %v994_v18, %v992_v16  ;;  %s1083_s21 = scalar_lea.vmem %s638_s20, 512  ;;  %p1088_p5 = scmp.lt.s32.totalorder %s638_s20, %s638_s20 }
 0x85f   :  { %p1084_p4 = scmp.ne.s32.totalorder %s638_s20, %s1083_s21  ;;  %p1089_p6 = scmp.lt.s32.totalorder %s1083_s21, %s1083_s21 }
 0x860   :  { %v624_v20 = vpack.c.bf16 %v621_v19, %v621_v19 }
 0x861   :  { %p1090_p7 = por %p1089_p6, %p1088_p5 }
 0x862   :  { %626 = vst [vmem:[#allocation10 + $0x1c] sm:$0xf] %v624_v20 }
 0x863   :  { %p1091_p8 = pnand %p1090_p7, %p1084_p4 }
 0x865   :  { %1094 = shalt.err (!%p1091_p8)
}
 0x866   :  { %s1095_s24 = scalar_lea.hbm %s1387_s4, 512 }
 0x867   :  { %p1096_p9 = scmp.ne.s32.totalorder %s1387_s4, %s1095_s24  ;;  %p1099_p10 = scmp.lt.u32.totalorder %s1095_s24, %s1387_s4 }
 0x869   :  { %p1101_p11 = pnand %p1099_p10, %p1096_p9 }
 0x86b   :  { %1104 = shalt.err (!%p1101_p11)
}
 0x86c   :  { %643 = dma.vmem_to_hbm [thread:$0]  %s638_s20, 512, %s1387_s4, [#allocation6], %s1114_s28, %s1114_s28, %s1115_s29  }
 0x86d   :  { %1109 = dma.done.wait [#allocation6], 512  }
 0x86e   :  { %1110 = vsyncadd [#allocation6], 4294966784 }
 0x86f   :  { %1111 = dma.done.wait [#allocation12], 128  }
 0x870   :  { %1112 = vsyncadd [#allocation12], 4294967168 }
 0x871   :  { %660 = vsyncpa [#allocation5], 1 }
 0x872   :  { %661 = vsyncpa [#allocation8], 1 }
 0x873   :  { %662 = vsyncpa [#allocation6], 1 }
 0x874   :  { %663 = vsyncpa [#allocation12], 1 }

</bundles_post_ra>
